<compile_context>
chip_gen: v5e
topology: v5e:2x2
jax: 0.10.0
libtpu: 0.0.40
codegen_flags: <defaults>
</compile_context>

<pallas_src>
import functools

import jax
import jax.numpy as jnp
from jax.experimental import pallas as pl
from jax.experimental.pallas import tpu as pltpu


def _matchnet_task_kernel(x_ref, w_ref, b_ref, ys_ref, yq_ref,
                          loss_ref, logits_ref, *, num_support):
    """One task per grid step: backbone + cosine matching head + CE loss."""
    eps = 1e-8
    S = num_support
    _, Q, N = logits_ref.shape
    inv_q = 1.0 / float(Q)

    # Backbone embedding for the whole per-task slab (support + query) in one
    # MXU pass: bf16 operands, f32 accumulation, then ReLU on the VPU.
    x = x_ref[0]                                               # (S+Q, f_in) bf16
    emb = jnp.maximum(
        jnp.dot(x, w_ref[...], preferred_element_type=jnp.float32)
        + b_ref[...], 0.0)                                     # (S+Q, Dp) f32

    # Per-row L2 normalization with torch's eps clamp:
    # 1/max(||v||, eps) == rsqrt(max(||v||^2, eps^2)).  Padding columns are 0.
    sq = jnp.sum(emb * emb, axis=-1, keepdims=True)
    nrm = emb * jax.lax.rsqrt(jnp.maximum(sq, eps * eps))

    s_n = nrm[:S].astype(jnp.bfloat16)                         # (S, Dp)
    q_n = nrm[S:].astype(jnp.bfloat16)                         # (Q, Dp)

    # Cosine similarity sim[q, s] via one MXU contraction over the padded dim.
    sim = jax.lax.dot_general(q_n, s_n, (((1,), (1,)), ((), ())),
                              preferred_element_type=jnp.float32)   # (Q, S)

    # Softmax over the support axis (torch dim=1); exact reciprocal for parity.
    m = jnp.max(sim, axis=-1, keepdims=True)
    e = jnp.exp(sim - m)
    att = e * pl.reciprocal(jnp.sum(e, axis=-1, keepdims=True), approx=False)

    # one_hot(y_support) built in-kernel from int32 labels (iota compare, VPU).
    ys = ys_ref[0]                                             # (S, 1) int32
    onehot_s = (jax.lax.broadcasted_iota(jnp.int32, (S, N), 1) == ys
                ).astype(jnp.float32)                          # (S, N)

    # logits = einsum('qs,sn->qn', attention, one_hot(y_support))
    logits = jnp.dot(att, onehot_s, preferred_element_type=jnp.float32)
    logits_ref[0] = logits

    # Cross entropy vs. y_query (mean over queries); target gather is a
    # VPU mask-sum instead of a gather / one-hot matmul.
    yq = yq_ref[0]                                             # (Q, 1) int32
    lmax = jnp.max(logits, axis=-1, keepdims=True)
    lse = lmax + jnp.log(jnp.sum(jnp.exp(logits - lmax), axis=-1, keepdims=True))
    tmask = (jax.lax.broadcasted_iota(jnp.int32, (Q, N), 1) == yq
             ).astype(jnp.float32)
    tgt = jnp.sum(logits * tmask, axis=-1, keepdims=True)      # (Q, 1)
    loss_ref[...] = (jnp.sum(lse - tgt) * inv_q).reshape(1, 1, 1)


def matchnet_forward(x, w, b, labels, *, num_ways, num_shots, num_queries,
                     num_tasks):
    """x: [B,C,H,W] f32 (NCHW), labels: [B] int. Returns (mean_loss, logits, y_query)."""
    B = x.shape[0]
    f_in = x.shape[1] * x.shape[2] * x.shape[3]
    per_task = num_ways * (num_shots + num_queries)
    S = num_ways * num_shots
    Q = num_ways * num_queries
    assert B == num_tasks * per_task

    # Deterministic split_support_query_set: per task [support block | query block].
    # Single un-split bf16 tensor: one (per_task, f_in) slab per task.
    x_t = x.reshape(num_tasks, per_task, f_in).astype(jnp.bfloat16)

    y_t = labels.reshape(num_tasks, per_task).astype(jnp.int32)
    y_support = y_t[:, :S]
    y_query = y_t[:, S:]
    ys = y_support.reshape(num_tasks, S, 1)                    # int32, tiny
    yq = y_query.reshape(num_tasks, Q, 1)                      # int32, tiny

    # Pad hidden dim: 128 multiple (lane width / v5e MXU); 256 multiple once
    # D > 128 to fill the 256-wide MXU N dim on v6e/v7x (zero cols: no effect).
    D = w.shape[1]
    pad_to = 128 if D <= 128 else 256
    Dp = ((D + pad_to - 1) // pad_to) * pad_to
    w_p = jnp.pad(w, ((0, 0), (0, Dp - D))).astype(jnp.bfloat16)
    b_p = jnp.pad(b.reshape(1, D), ((0, 0), (0, Dp - D))).astype(jnp.float32)

    kernel = functools.partial(_matchnet_task_kernel, num_support=S)
    loss_pt, logits = pl.pallas_call(
        kernel,
        grid=(num_tasks,),
        in_specs=[
            pl.BlockSpec((1, per_task, f_in), lambda t: (t, 0, 0)),
            pl.BlockSpec((f_in, Dp), lambda t: (0, 0)),   # resident across tasks
            pl.BlockSpec((1, Dp), lambda t: (0, 0)),
            pl.BlockSpec((1, S, 1), lambda t: (t, 0, 0)),
            pl.BlockSpec((1, Q, 1), lambda t: (t, 0, 0)),
        ],
        out_specs=(
            pl.BlockSpec((1, 1, 1), lambda t: (t, 0, 0)),
            # N is tiny here (masked store is negligible); pad toward 128 and
            # slice in the wrapper if Q*N ever grows.
            pl.BlockSpec((1, Q, num_ways), lambda t: (t, 0, 0)),
        ),
        out_shape=(
            jax.ShapeDtypeStruct((num_tasks, 1, 1), jnp.float32),
            jax.ShapeDtypeStruct((num_tasks, Q, num_ways), jnp.float32),
        ),
        compiler_params=pltpu.CompilerParams(
            dimension_semantics=("parallel",)),   # megacore-shardable on v7x
    )(x_t, w_p, b_p, ys, yq)

    mean_loss = jnp.mean(loss_pt)                 # == total_loss / num_tasks
    return mean_loss, logits, y_query


if __name__ == "__main__":
    key = jax.random.PRNGKey(0)
    num_tasks, num_ways, num_shots, num_queries = 2, 4, 1, 2
    C, H, W = 4, 16, 16
    D = 32
    S = num_ways * num_shots          # support per task = 4
    Q = num_ways * num_queries        # queries per task = 8
    B = num_tasks * (S + Q)           # 24

    k_x, k_w, k_b = jax.random.split(key, 3)
    x = jax.random.normal(k_x, (B, C, H, W), jnp.float32)   # NCHW input
    f_in = C * H * W
    w = jax.random.normal(k_w, (f_in, D), jnp.float32) * 0.02
    b = jax.random.normal(k_b, (D,), jnp.float32) * 0.01

    # labels: per task, support ways 0..N-1 then query ways 0..N-1
    y_s_task = jnp.repeat(jnp.arange(num_ways), num_shots)
    y_q_task = jnp.repeat(jnp.arange(num_ways), num_queries)
    labels = jnp.concatenate(
        [jnp.concatenate([y_s_task, y_q_task])] * num_tasks)

    mean_loss, logits, y_query = matchnet_forward(
        x, w, b, labels, num_ways=num_ways, num_shots=num_shots,
        num_queries=num_queries, num_tasks=num_tasks)

    # accuracy from the LAST task's logits, as in the torch no_grad block
    predicted = jnp.argmax(logits[-1], axis=1)
    total = num_queries * num_ways      # args.num_queries * args.test_num_ways
    correct = jnp.sum(predicted == y_query[-1])
    accuracy = 100.0 * correct / total

    jax.block_until_ready((mean_loss, logits, accuracy))
    print("KERNEL_OK")
</pallas_src>

<mosaic_0001>
module attributes {stable_mosaic.version = 11 : i64} {
  func.func @_matchnet_task_kernel(%arg0: i32, %arg1: memref<1x12x1024xbf16, #tpu.memory_space<vmem>>, %arg2: memref<1024x128xbf16, #tpu.memory_space<vmem>>, %arg3: memref<1x128xf32, #tpu.memory_space<vmem>>, %arg4: memref<1x4x1xi32, #tpu.memory_space<vmem>>, %arg5: memref<1x8x1xi32, #tpu.memory_space<vmem>>, %arg6: memref<1x1x1xf32, #tpu.memory_space<vmem>>, %arg7: memref<1x8x4xf32, #tpu.memory_space<vmem>>) attributes {dimension_semantics = [#tpu.dimension_semantics<parallel>], iteration_bounds = array<i64: 2>, scalar_prefetch = 0 : i64, scratch_operands = 0 : i64, tpu.core_type = #tpu.core_type<tc>, window_params = [{transform_indices = @transform_0, window_bounds = array<i64: 1, 12, 1024>}, {pipeline_mode = #tpu.pipeline_mode<synchronous>, transform_indices = @transform_1, window_bounds = array<i64: 1024, 128>}, {pipeline_mode = #tpu.pipeline_mode<synchronous>, transform_indices = @transform_2, window_bounds = array<i64: 1, 128>}, {transform_indices = @transform_3, window_bounds = array<i64: 1, 4, 1>}, {transform_indices = @transform_4, window_bounds = array<i64: 1, 8, 1>}, {transform_indices = @transform_5, window_bounds = array<i64: 1, 1, 1>}, {transform_indices = @transform_6, window_bounds = array<i64: 1, 8, 4>}]} {
    %c0 = arith.constant 0 : index
    %c0_0 = arith.constant 0 : index
    %c0_1 = arith.constant 0 : index
    %0 = vector.load %arg1[%c0, %c0_0, %c0_1] : memref<1x12x1024xbf16, #tpu.memory_space<vmem>>, vector<1x12x1024xbf16>
    %1 = vector.shape_cast %0 : vector<1x12x1024xbf16> to vector<12x1024xbf16>
    %c0_2 = arith.constant 0 : index
    %c0_3 = arith.constant 0 : index
    %2 = vector.load %arg2[%c0_2, %c0_3] : memref<1024x128xbf16, #tpu.memory_space<vmem>>, vector<1024x128xbf16>
    %cst = arith.constant dense<0.000000e+00> : vector<12x128xf32>
    %3 = tpu.matmul %1, %2, %cst {dimension_numbers = #tpu.dot_dimension_numbers<[1], [0], [0], [1], [0, 0, 1, 1], [], []>} : vector<12x1024xbf16>, vector<1024x128xbf16>, vector<12x128xf32> -> vector<12x128xf32>
    %c0_4 = arith.constant 0 : index
    %c0_5 = arith.constant 0 : index
    %4 = vector.load %arg3[%c0_4, %c0_5] : memref<1x128xf32, #tpu.memory_space<vmem>>, vector<1x128xf32>
    %5 = vector.broadcast %4 : vector<1x128xf32> to vector<12x128xf32>
    %6 = arith.addf %3, %5 : vector<12x128xf32>
    %cst_6 = arith.constant 0.000000e+00 : f32
    %7 = vector.broadcast %cst_6 : f32 to vector<12x128xf32>
    %8 = arith.maximumf %6, %7 : vector<12x128xf32>
    %9 = arith.mulf %8, %8 : vector<12x128xf32>
    %cst_7 = arith.constant dense<0.000000e+00> : vector<12xf32>
    %10 = vector.multi_reduction <add>, %9, %cst_7 [1] : vector<12x128xf32> to vector<12xf32>
    %11 = vector.shape_cast %10 : vector<12xf32> to vector<12x1xf32>
    %cst_8 = arith.constant 1.000000e-16 : f32
    %12 = vector.broadcast %cst_8 : f32 to vector<12x1xf32>
    %13 = arith.maximumf %11, %12 : vector<12x1xf32>
    %14 = math.rsqrt %13 : vector<12x1xf32>
    %15 = vector.broadcast %14 : vector<12x1xf32> to vector<12x128xf32>
    %16 = arith.mulf %8, %15 : vector<12x128xf32>
    %17 = vector.extract_strided_slice %16 {offsets = [0, 0], sizes = [4, 128], strides = [1, 1]} : vector<12x128xf32> to vector<4x128xf32>
    %18 = arith.truncf %17 : vector<4x128xf32> to vector<4x128xbf16>
    %19 = vector.extract_strided_slice %16 {offsets = [4, 0], sizes = [8, 128], strides = [1, 1]} : vector<12x128xf32> to vector<8x128xf32>
    %20 = arith.truncf %19 : vector<8x128xf32> to vector<8x128xbf16>
    %cst_9 = arith.constant dense<0.000000e+00> : vector<8x4xf32>
    %21 = tpu.matmul %20, %18, %cst_9 {dimension_numbers = #tpu.dot_dimension_numbers<[1], [1], [0], [0], [0, 0, 1, 0], [], []>} : vector<8x128xbf16>, vector<4x128xbf16>, vector<8x4xf32> -> vector<8x4xf32>
    %cst_10 = arith.constant dense<0xFF800000> : vector<8xf32>
    %22 = vector.multi_reduction <maximumf>, %21, %cst_10 [1] : vector<8x4xf32> to vector<8xf32>
    %23 = vector.shape_cast %22 : vector<8xf32> to vector<8x1xf32>
    %24 = vector.broadcast %23 : vector<8x1xf32> to vector<8x4xf32>
    %25 = arith.subf %21, %24 : vector<8x4xf32>
    %26 = math.exp %25 : vector<8x4xf32>
    %cst_11 = arith.constant dense<0.000000e+00> : vector<8xf32>
    %27 = vector.multi_reduction <add>, %26, %cst_11 [1] : vector<8x4xf32> to vector<8xf32>
    %28 = vector.shape_cast %27 : vector<8xf32> to vector<8x1xf32>
    %29 = tpu.reciprocal %28 : vector<8x1xf32> -> vector<8x1xf32>
    %30 = vector.broadcast %29 : vector<8x1xf32> to vector<8x4xf32>
    %31 = arith.mulf %26, %30 : vector<8x4xf32>
    %c0_12 = arith.constant 0 : index
    %c0_13 = arith.constant 0 : index
    %c0_14 = arith.constant 0 : index
    %32 = vector.load %arg4[%c0_12, %c0_13, %c0_14] : memref<1x4x1xi32, #tpu.memory_space<vmem>>, vector<1x4x1xi32>
    %33 = vector.shape_cast %32 : vector<1x4x1xi32> to vector<4x1xi32>
    %34 = tpu.iota {dimensions = array<i32: 1>} : vector<4x4xi32>
    %35 = vector.broadcast %33 : vector<4x1xi32> to vector<4x4xi32>
    %36 = arith.cmpi eq, %34, %35 : vector<4x4xi32>
    %37 = arith.extui %36 : vector<4x4xi1> to vector<4x4xi32>
    %38 = arith.sitofp %37 : vector<4x4xi32> to vector<4x4xf32>
    %cst_15 = arith.constant dense<0.000000e+00> : vector<8x4xf32>
    %39 = tpu.matmul %31, %38, %cst_15 {dimension_numbers = #tpu.dot_dimension_numbers<[1], [0], [0], [1], [0, 0, 1, 1], [], []>} : vector<8x4xf32>, vector<4x4xf32>, vector<8x4xf32> -> vector<8x4xf32>
    %c0_16 = arith.constant 0 : index
    %c0_17 = arith.constant 0 : index
    %c0_18 = arith.constant 0 : index
    %40 = vector.load %arg7[%c0_16, %c0_17, %c0_18] : memref<1x8x4xf32, #tpu.memory_space<vmem>>, vector<1x8x4xf32>
    %41 = vector.shape_cast %40 : vector<1x8x4xf32> to vector<8x4xf32>
    %42 = vector.shape_cast %39 : vector<8x4xf32> to vector<1x8x4xf32>
    tpu.vector_store %arg7[%c0_16, %c0_17, %c0_18], %42 {strides = array<i32>} : memref<1x8x4xf32, #tpu.memory_space<vmem>>, vector<1x8x4xf32>,
    %c0_19 = arith.constant 0 : index
    %c0_20 = arith.constant 0 : index
    %c0_21 = arith.constant 0 : index
    %43 = vector.load %arg5[%c0_19, %c0_20, %c0_21] : memref<1x8x1xi32, #tpu.memory_space<vmem>>, vector<1x8x1xi32>
    %44 = vector.shape_cast %43 : vector<1x8x1xi32> to vector<8x1xi32>
    %cst_22 = arith.constant dense<0xFF800000> : vector<8xf32>
    %45 = vector.multi_reduction <maximumf>, %39, %cst_22 [1] : vector<8x4xf32> to vector<8xf32>
    %46 = vector.shape_cast %45 : vector<8xf32> to vector<8x1xf32>
    %47 = vector.broadcast %46 : vector<8x1xf32> to vector<8x4xf32>
    %48 = arith.subf %39, %47 : vector<8x4xf32>
    %49 = math.exp %48 : vector<8x4xf32>
    %cst_23 = arith.constant dense<0.000000e+00> : vector<8xf32>
    %50 = vector.multi_reduction <add>, %49, %cst_23 [1] : vector<8x4xf32> to vector<8xf32>
    %51 = vector.shape_cast %50 : vector<8xf32> to vector<8x1xf32>
    %52 = math.log %51 : vector<8x1xf32>
    %53 = arith.addf %46, %52 : vector<8x1xf32>
    %54 = tpu.iota {dimensions = array<i32: 1>} : vector<8x4xi32>
    %55 = vector.broadcast %44 : vector<8x1xi32> to vector<8x4xi32>
    %56 = arith.cmpi eq, %54, %55 : vector<8x4xi32>
    %57 = arith.extui %56 : vector<8x4xi1> to vector<8x4xi32>
    %58 = arith.sitofp %57 : vector<8x4xi32> to vector<8x4xf32>
    %59 = arith.mulf %39, %58 : vector<8x4xf32>
    %cst_24 = arith.constant dense<0.000000e+00> : vector<8xf32>
    %60 = vector.multi_reduction <add>, %59, %cst_24 [1] : vector<8x4xf32> to vector<8xf32>
    %61 = vector.shape_cast %60 : vector<8xf32> to vector<8x1xf32>
    %62 = arith.subf %53, %61 : vector<8x1xf32>
    %63 = vector.shape_cast %62 : vector<8x1xf32> to vector<1x8x1xf32>
    %cst_25 = arith.constant dense<0.000000e+00> : vector<1xf32>
    %64 = vector.multi_reduction <add>, %63, %cst_25 [1, 2] : vector<1x8x1xf32> to vector<1xf32>
    %65 = vector.shape_cast %64 : vector<1xf32> to vector<1x1x1xf32>
    %66 = vector.extract %65[0, 0, 0] : f32 from vector<1x1x1xf32>
    %cst_26 = arith.constant 1.250000e-01 : f32
    %67 = arith.mulf %66, %cst_26 : f32
    %68 = vector.broadcast %67 : f32 to vector<1x1x1xf32>
    %c0_27 = arith.constant 0 : index
    %c0_28 = arith.constant 0 : index
    %c0_29 = arith.constant 0 : index
    %69 = vector.load %arg6[%c0_27, %c0_28, %c0_29] : memref<1x1x1xf32, #tpu.memory_space<vmem>>, vector<1x1x1xf32>
    tpu.vector_store %arg6[%c0_27, %c0_28, %c0_29], %68 {strides = array<i32>} : memref<1x1x1xf32, #tpu.memory_space<vmem>>, vector<1x1x1xf32>,
    return
  }
  func.func @transform_0(%arg0: i32) -> (i32, i32, i32) {
    %c0_i32 = arith.constant 0 : i32
    %c0_i32_0 = arith.constant 0 : i32
    %c0_i32_1 = arith.constant 0 : i32
    return %arg0, %c0_i32, %c0_i32_0 : i32, i32, i32
  }
  func.func @transform_1(%arg0: i32) -> (i32, i32) {
    %c0_i32 = arith.constant 0 : i32
    %c0_i32_0 = arith.constant 0 : i32
    %c0_i32_1 = arith.constant 0 : i32
    return %c0_i32, %c0_i32_0 : i32, i32
  }
  func.func @transform_2(%arg0: i32) -> (i32, i32) {
    %c0_i32 = arith.constant 0 : i32
    %c0_i32_0 = arith.constant 0 : i32
    %c0_i32_1 = arith.constant 0 : i32
    return %c0_i32, %c0_i32_0 : i32, i32
  }
  func.func @transform_3(%arg0: i32) -> (i32, i32, i32) {
    %c0_i32 = arith.constant 0 : i32
    %c0_i32_0 = arith.constant 0 : i32
    %c0_i32_1 = arith.constant 0 : i32
    return %arg0, %c0_i32, %c0_i32_0 : i32, i32, i32
  }
  func.func @transform_4(%arg0: i32) -> (i32, i32, i32) {
    %c0_i32 = arith.constant 0 : i32
    %c0_i32_0 = arith.constant 0 : i32
    %c0_i32_1 = arith.constant 0 : i32
    return %arg0, %c0_i32, %c0_i32_0 : i32, i32, i32
  }
  func.func @transform_5(%arg0: i32) -> (i32, i32, i32) {
    %c0_i32 = arith.constant 0 : i32
    %c0_i32_0 = arith.constant 0 : i32
    %c0_i32_1 = arith.constant 0 : i32
    return %arg0, %c0_i32, %c0_i32_0 : i32, i32, i32
  }
  func.func @transform_6(%arg0: i32) -> (i32, i32, i32) {
    %c0_i32 = arith.constant 0 : i32
    %c0_i32_0 = arith.constant 0 : i32
    %c0_i32_1 = arith.constant 0 : i32
    return %arg0, %c0_i32, %c0_i32_0 : i32, i32, i32
  }
}

</mosaic_0001>

<bundles_post_ra>
// kernel: tpu_custom_call.1
= control target key start
LH: loop header
LB: loop body
LE: loop exit
PB: predicated region body
PF: predicated region fallthrough
CT: control target
= control target key end

     0   :  { %12 = vsyncpa [#allocation3], 0  ;;  %s1754_s21 = smov 0   ;;  %s1824_s0 = inlined_call_operand.vmem [shape: bf16[2,12,1024], index: 0, kind: input, shape index: {}]   ;;  %s1825_s1 = inlined_call_operand.hbm [shape: bf16[1024,128], index: 1, kind: input, shape index: {}]   ;;  %s1826_s2 = inlined_call_operand.vmem [shape: f32[1,128], index: 2, kind: input, shape index: {}]   ;;  %s1827_s3 = inlined_call_operand.vmem [shape: s32[2,4,1], index: 3, kind: input, shape index: {}]   ;;  %s1828_s4 = inlined_call_operand.vmem [shape: s32[2,8,1], index: 4, kind: input, shape index: {}]   ;;  %s1829_s5 = inlined_call_operand.vmem [shape: f32[2,1,1], index: 5, kind: output, shape index: {0}]   ;;  %s1830_s6 = inlined_call_operand.vmem [shape: f32[2,8,4], index: 6, kind: output, shape index: {1}]  }
   0x1 LB: > { %s206_s24 = sshll.u32 %s1825_s1, 4  ;;  %s1763_s25 = sadd.s32 4294967295, %s1712_s21   ;;  %s1712_s21 = sphi %s1754_s21, %s18_s21   ;;  %s207_s24 = int_to_ptr.hbm [resolvable:$true] %s206_s24 }
   0x2   : > { %p1255_p0 = scmp.ge.s32.totalorder %s1712_s21, 1  ;;  %p195_p1 = scmp.lt.s32.totalorder %s1712_s21, 3 }
   0x3   : > { %p1642_p2 = scmp.eq.s32.totalorder %s1763_s25, 0  ;;  %s1714_s26 = smov [#allocation2]  }
   0x4   : > { %p196_p3 = pnand %p1255_p0, %p195_p1  ;;  %s208_s27 = sshll.u32 %s1714_s26, 4  ;;  %s209_s27 = int_to_ptr.vmem [resolvable:$true] %s208_s27 }
   0x5   : > { %s1715_s28 = smov 64   ;;  %s1716_s29 = smov 4  }
   0x6   : > { %p1638_p4 = pneg %p196_p3  ;;  %249 = sbr.rel (%p196_p3) target bundleno = 1326 (0x52e), region = 40 }
   0x8   : > { %p1639_p5 = pnand %p1642_p2, %p1638_p4 }
   0xa   : > { %1641 = dma.hbm_to_vmem [thread:$0]  (!%p1639_p5), %s207_s24, 8192, %s209_s27, [#allocation3], %s1715_s28, %s1715_s28, %s1716_s29  }
   0xb   : > { %1707 = dma.done.wait (%p1642_p2), [#allocation3], 8192  }
   0xc   : > { %1709 = vsyncadd (%p1642_p2), [#allocation3], 4294959104  ;;  %v1575_v0 = vld [vmem:[#allocation2 + $0x38] sm:$0xff]  ;;  %v1574_v4 = vld [vmem:[#allocation2 + $0x30] sm:$0xff]  ;;  %p290_p6 = scmp.lt.s32.totalorder %s1763_s25, 1  ;;  %vm993_vm0 = vcmask 1043456  }
   0xd   : > { %v1583_v1 = vld [vmem:[#allocation2 + $0x78] sm:$0xff]  ;;  %875 = vmatpush.bf16.msra.mxu0 %v1575_v0  ;;  %v1582_v5 = vld [vmem:[#allocation2 + $0x70] sm:$0xff]  ;;  %v1573_v8 = vld [vmem:[#allocation2 + $0x28] sm:$0xff]  ;;  %vm1039_vm7 = vcmask 31744   ;;  %vm1124_vm14 = vcmask 7168   ;;  %vm1137_vm15 = vcmask 0  }
   0xe   : > { %v1591_v2 = vld [vmem:[#allocation2 + $0xb8] sm:$0xff]  ;;  %889 = vmatpush.bf16.msra.mxu1 %v1583_v1  ;;  %v1590_v6 = vld [vmem:[#allocation2 + $0xb0] sm:$0xff]  ;;  %v1581_v9 = vld [vmem:[#allocation2 + $0x68] sm:$0xff]  ;;  %s1832_s25 = smov (!%p290_p6, %s1763_s25), 1 }
   0xf   : > { %v1599_v3 = vld [vmem:[#allocation2 + $0xf8] sm:$0xff]  ;;  %903 = vmatpush.bf16.msra.mxu2 %v1591_v2  ;;  %v1598_v7 = vld [vmem:[#allocation2 + $0xf0] sm:$0xff]  ;;  %v1589_v10 = vld [vmem:[#allocation2 + $0xa8] sm:$0xff]  ;;  %s1559_s30 = sshll.u32 %s1832_s25, 6  ;;  %s1262_s12 = sshll.u32 %s1832_s25, 2 }
  0x10   : > { %917 = vmatpush.bf16.msra.mxu3 %v1599_v3  ;;  %v1597_v11 = vld [vmem:[#allocation2 + $0xe8] sm:$0xff]  ;;  %v1572_v12 = vld [vmem:[#allocation2 + $0x20] sm:$0xff]  ;;  %v1571_v16 = vld [vmem:[#allocation2 + $0x18] sm:$0xff]  ;;  %s1776_s9 = scalar_lea.vmem %s1824_s0, %s1559_s30  ;;  %s298_s15 = scalar_lea.vmem %s1827_s3, %s1262_s12 }
  0x11   : > { %876 = vmatpush.bf16.msra.mxu0 %v1574_v4  ;;  %v1580_v13 = vld [vmem:[#allocation2 + $0x60] sm:$0xff]  ;;  %v1579_v17 = vld [vmem:[#allocation2 + $0x58] sm:$0xff]  ;;  %v1570_v20 = vld [vmem:[#allocation2 + $0x10] sm:$0xff]  ;;  %s1263_s16 = sshll.u32 %s1832_s25, 3  ;;  %s305_s28 = scalar_lea.vmem %s1829_s5, %s1832_s25 }
  0x12   : > { %890 = vmatpush.bf16.msra.mxu1 %v1582_v5  ;;  %v1588_v14 = vld [vmem:[#allocation2 + $0xa0] sm:$0xff]  ;;  %v1587_v18 = vld [vmem:[#allocation2 + $0x98] sm:$0xff]  ;;  %v1578_v21 = vld [vmem:[#allocation2 + $0x50] sm:$0xff]  ;;  %s302_s19 = scalar_lea.vmem %s1828_s4, %s1263_s16  ;;  %s309_s23 = scalar_lea.vmem %s1830_s6, %s1263_s16 }
  0x13   : > { %904 = vmatpush.bf16.msra.mxu2 %v1590_v6  ;;  %v1596_v15 = vld [vmem:[#allocation2 + $0xe0] sm:$0xff]  ;;  %v1595_v19 = vld [vmem:[#allocation2 + $0xd8] sm:$0xff]  ;;  %v1586_v22 = vld [vmem:[#allocation2 + $0x90] sm:$0xff] }
  0x14   : > { %918 = vmatpush.bf16.msra.mxu3 %v1598_v7  ;;  %v1594_v23 = vld [vmem:[#allocation2 + $0xd0] sm:$0xff]  ;;  %v1569_v24 = vld [vmem:[#allocation2 + $0x8] sm:$0xff]  ;;  %v1568_v28 = vld [vmem:[#allocation2] sm:$0xff] }
  0x15   : > { %877 = vmatpush.bf16.msra.mxu0 %v1573_v8  ;;  %v1577_v25 = vld [vmem:[#allocation2 + $0x48] sm:$0xff]  ;;  %v1576_v29 = vld [vmem:[#allocation2 + $0x40] sm:$0xff]  ;;  %v1607_v32 = vld [vmem:[#allocation2 + $0x138] sm:$0xff] }
  0x16   : > { %891 = vmatpush.bf16.msra.mxu1 %v1581_v9  ;;  %v1585_v26 = vld [vmem:[#allocation2 + $0x88] sm:$0xff]  ;;  %v1584_v30 = vld [vmem:[#allocation2 + $0x80] sm:$0xff]  ;;  %v1615_v33 = vld [vmem:[#allocation2 + $0x178] sm:$0xff] }
  0x17   : > { %905 = vmatpush.bf16.msra.mxu2 %v1589_v10  ;;  %v1593_v27 = vld [vmem:[#allocation2 + $0xc8] sm:$0xff]  ;;  %v1592_v31 = vld [vmem:[#allocation2 + $0xc0] sm:$0xff]  ;;  %v1623_v42 = vld [vmem:[#allocation2 + $0x1b8] sm:$0xff] }
  0x18   : > { %919 = vmatpush.bf16.msra.mxu3 %v1597_v11  ;;  %v1275_v34 = vld [vmem:[%s1776_s9 + $0x8] sm:$0xf]  ;;  %v1267_v36 = vld [vmem:[%s1776_s9] sm:$0xf]  ;;  %v1561_v38 = vld [vmem:[%s1776_s9 + $0xc] sm:$0xf] }
  0x19   : > { %878 = vmatpush.bf16.msra.mxu0 %v1572_v12  ;;  %v1565_v35 = vld [vmem:[%s1776_s9 + $0x24] sm:$0x30]  ;;  %v1564_v37 = vld [vmem:[%s1776_s9 + $0x1c] sm:$0x30]  ;;  %v1277_v39 = vld [vmem:[%s1776_s9 + $0x28] sm:$0x30] }
  0x1a   : > { %892 = vmatpush.bf16.msra.mxu1 %v1580_v13  ;;  %v1560_v40 = vld [vmem:[%s1776_s9 + $0x4] sm:$0xf]  ;;  %v1631_v43 = vld [vmem:[#allocation2 + $0x1f8] sm:$0xff]  ;;  %v1276_v44 = vor.u32 %v1565_v35, %v1275_v34  ;;  %v1268_v45 = vor.u32 %v1564_v37, %v1267_v36  ;;  %v1280_v46 = vor.u32 %v1561_v38, %v1277_v39  ;;  %v1606_v48 = vld [vmem:[#allocation2 + $0x130] sm:$0xff] }
  0x1b   : > { %906 = vmatpush.bf16.msra.mxu2 %v1588_v14  ;;  %v1269_v41 = vld [vmem:[%s1776_s9 + $0x20] sm:$0x30]  ;;  %v1614_v49 = vld [vmem:[#allocation2 + $0x170] sm:$0xff]  ;;  %v1605_v52 = vld [vmem:[#allocation2 + $0x128] sm:$0xff] }
  0x1c   : > { %920 = vmatpush.bf16.msra.mxu3 %v1596_v15  ;;  %v1272_v47 = vor.u32 %v1560_v40, %v1269_v41  ;;  %v1622_v50 = vld [vmem:[#allocation2 + $0x1b0] sm:$0xff]  ;;  %v1613_v53 = vld [vmem:[#allocation2 + $0x168] sm:$0xff]  ;;  %v1604_v56 = vld [vmem:[#allocation2 + $0x120] sm:$0xff] }
  0x1d   : > { %879 = vmatpush.bf16.msra.mxu0 %v1571_v16  ;;  %v1630_v51 = vld [vmem:[#allocation2 + $0x1f0] sm:$0xff]  ;;  %v1621_v54 = vld [vmem:[#allocation2 + $0x1a8] sm:$0xff]  ;;  %v1612_v57 = vld [vmem:[#allocation2 + $0x160] sm:$0xff] }
  0x1e   : > { %893 = vmatpush.bf16.msra.mxu1 %v1579_v17  ;;  %v1629_v55 = vld [vmem:[#allocation2 + $0x1e8] sm:$0xff]  ;;  %v1620_v58 = vld [vmem:[#allocation2 + $0x1a0] sm:$0xff]  ;;  %v1603_v60 = vld [vmem:[#allocation2 + $0x118] sm:$0xff] }
  0x1f   : > { %907 = vmatpush.bf16.msra.mxu2 %v1587_v18  ;;  %v1628_v59 = vld [vmem:[#allocation2 + $0x1e0] sm:$0xff]  ;;  %v1611_v61 = vld [vmem:[#allocation2 + $0x158] sm:$0xff]  ;;  %v1602_v0 = vld [vmem:[#allocation2 + $0x110] sm:$0xff] }
  0x20   : > { %921 = vmatpush.bf16.msra.mxu3 %v1595_v19  ;;  %v1619_v62 = vld [vmem:[#allocation2 + $0x198] sm:$0xff]  ;;  %v1610_v1 = vld [vmem:[#allocation2 + $0x150] sm:$0xff]  ;;  %v1601_v4 = vld [vmem:[#allocation2 + $0x108] sm:$0xff] }
  0x21   : > { %880 = vmatpush.bf16.msra.mxu0 %v1570_v20  ;;  %v1627_v63 = vld [vmem:[#allocation2 + $0x1d8] sm:$0xff]  ;;  %v1618_v2 = vld [vmem:[#allocation2 + $0x190] sm:$0xff]  ;;  %v1609_v5 = vld [vmem:[#allocation2 + $0x148] sm:$0xff] }
  0x22   : > { %894 = vmatpush.bf16.msra.mxu1 %v1578_v21  ;;  %v1626_v3 = vld [vmem:[#allocation2 + $0x1d0] sm:$0xff]  ;;  %v1617_v6 = vld [vmem:[#allocation2 + $0x188] sm:$0xff]  ;;  %v1600_v8 = vld [vmem:[#allocation2 + $0x100] sm:$0xff] }
  0x23   : > { %908 = vmatpush.bf16.msra.mxu2 %v1586_v22  ;;  %v1625_v7 = vld [vmem:[#allocation2 + $0x1c8] sm:$0xff]  ;;  %v1608_v9 = vld [vmem:[#allocation2 + $0x140] sm:$0xff]  ;;  %v1283_v12 = vld [vmem:[%s1776_s9 + $0x10] sm:$0xf] }
  0x24   : > { %922 = vmatpush.bf16.msra.mxu3 %v1594_v23  ;;  %v1616_v10 = vld [vmem:[#allocation2 + $0x180] sm:$0xff]  ;;  %v1566_v13 = vld [vmem:[%s1776_s9 + $0x2c] sm:$0x30]  ;;  %v1562_v14 = vld [vmem:[%s1776_s9 + $0x14] sm:$0xf] }
  0x25   : > { %881 = vmatpush.bf16.msra.mxu0 %v1569_v24  ;;  %v1624_v11 = vld [vmem:[#allocation2 + $0x1c0] sm:$0xff]  ;;  %v1285_v15 = vld [vmem:[%s1776_s9 + $0x30] sm:$0x30]  ;;  %v1291_v16 = vld [vmem:[%s1776_s9 + $0x18] sm:$0xf]  ;;  %v1284_v20 = vor.u32 %v1566_v13, %v1283_v12 }
  0x26   : > { %895 = vmatpush.bf16.msra.mxu1 %v1577_v25  ;;  %v1567_v17 = vld [vmem:[%s1776_s9 + $0x34] sm:$0x30]  ;;  %v1563_v18 = vld [vmem:[%s1776_s9 + $0x1c] sm:$0xf]  ;;  %v1288_v21 = vor.u32 %v1562_v14, %v1285_v15  ;;  %v1659_v25 = vld [vmem:[%s1826_s2] ss:$0 sm:$0xff] }
  0x27   : > { %909 = vmatpush.bf16.msra.mxu2 %v1585_v26  ;;  %v1293_v19 = vld [vmem:[%s1776_s9 + $0x38] sm:$0x30]  ;;  %v1292_v22 = vor.u32 %v1567_v17, %v1291_v16 }
  0x28   : > { %923 = vmatpush.bf16.msra.mxu3 %v1593_v27  ;;  %v1296_v23 = vor.u32 %v1563_v18, %v1293_v19 }
  0x29   : > { %882 = vmatpush.bf16.msra.mxu0 %v1568_v28 }
  0x2a   : > { %896 = vmatpush.bf16.msra.mxu1 %v1576_v29 }
  0x2b   : > { %910 = vmatpush.bf16.msra.mxu2 %v1584_v30 }
  0x2c   : > { %924 = vmatpush.bf16.msra.mxu3 %v1592_v31  ;;  %883 = vmatmul.bf16.vlgmr.msra.gmra.mxu0 %v1268_v45 }
  0x2d   : > { %931 = vmatpush.bf16.msrb.mxu0 %v1607_v32  ;;  %897 = vmatmul.bf16.vlgmr.msra.gmra.mxu1 %v1272_v47 }
  0x2e   : > { %945 = vmatpush.bf16.msrb.mxu1 %v1615_v33  ;;  %911 = vmatmul.bf16.vlgmr.msra.gmra.mxu2 %v1276_v44 }
  0x2f   : > { %959 = vmatpush.bf16.msrb.mxu2 %v1623_v42  ;;  %925 = vmatmul.bf16.vlgmr.msra.gmra.mxu3 %v1280_v46 }
  0x30   : > { %973 = vmatpush.bf16.msrb.mxu3 %v1631_v43 }
  0x31   : > { %932 = vmatpush.bf16.msrb.mxu0 %v1606_v48 }
  0x32   : > { %946 = vmatpush.bf16.msrb.mxu1 %v1614_v49 }
  0x33   : > { %960 = vmatpush.bf16.msrb.mxu2 %v1622_v50 }
  0x34   : > { %974 = vmatpush.bf16.msrb.mxu3 %v1630_v51 }
  0x35   : > { %933 = vmatpush.bf16.msrb.mxu0 %v1605_v52 }
  0x36   : > { %947 = vmatpush.bf16.msrb.mxu1 %v1613_v53 }
  0x37   : > { %961 = vmatpush.bf16.msrb.mxu2 %v1621_v54 }
  0x38   : > { %975 = vmatpush.bf16.msrb.mxu3 %v1629_v55 }
  0x39   : > { %934 = vmatpush.bf16.msrb.mxu0 %v1604_v56 }
  0x3a   : > { %948 = vmatpush.bf16.msrb.mxu1 %v1612_v57 }
  0x3b   : > { %962 = vmatpush.bf16.msrb.mxu2 %v1620_v58 }
  0x3c   : > { %976 = vmatpush.bf16.msrb.mxu3 %v1628_v59 }
  0x3d   : > { %935 = vmatpush.bf16.msrb.mxu0 %v1603_v60 }
  0x3e   : > { %949 = vmatpush.bf16.msrb.mxu1 %v1611_v61 }
  0x3f   : > { %963 = vmatpush.bf16.msrb.mxu2 %v1619_v62 }
  0x40   : > { %977 = vmatpush.bf16.msrb.mxu3 %v1627_v63 }
  0x41   : > { %936 = vmatpush.bf16.msrb.mxu0 %v1602_v0 }
  0x42   : > { %950 = vmatpush.bf16.msrb.mxu1 %v1610_v1 }
  0x43   : > { %964 = vmatpush.bf16.msrb.mxu2 %v1618_v2 }
  0x44   : > { %978 = vmatpush.bf16.msrb.mxu3 %v1626_v3 }
  0x45   : > { %937 = vmatpush.bf16.msrb.mxu0 %v1601_v4 }
  0x46   : > { %951 = vmatpush.bf16.msrb.mxu1 %v1609_v5 }
  0x47   : > { %965 = vmatpush.bf16.msrb.mxu2 %v1617_v6 }
  0x48   : > { %979 = vmatpush.bf16.msrb.mxu3 %v1625_v7 }
  0x49   : > { %938 = vmatpush.bf16.msrb.mxu0 %v1600_v8 }
  0x4a   : > { %952 = vmatpush.bf16.msrb.mxu1 %v1608_v9 }
  0x4b   : > { %966 = vmatpush.bf16.msrb.mxu2 %v1616_v10 }
  0x4c   : > { %980 = vmatpush.bf16.msrb.mxu3 %v1624_v11  ;;  %939 = vmatmul.bf16.vlgmr.msrb.gmra.mxu0 %v1284_v20 }
  0x4d   : > { %953 = vmatmul.bf16.vlgmr.msrb.gmra.mxu1 %v1288_v21 }
  0x4e   : > { %967 = vmatmul.bf16.vlgmr.msrb.gmra.mxu2 %v1292_v22 }
  0x4f   : > { %981 = vmatmul.bf16.vlgmr.msrb.gmra.mxu3 %v1296_v23 }
  0xa9   : > { %v884_v24 = vpop.f32.mrf.mxu0 }
  0xaa   : > { %v898_v26 = vpop.f32.mrf.mxu1  ;;  %v885_v27 = vadd.f32 %v1659_v25, %v884_v24  ;;  %v1064_v24 = vld [vmem:[%s298_s15] sm:$0xf] }
  0xac   : > { %v899_v30 = vadd.f32 %v898_v26, %v885_v27 }
  0xb1   : > { %v912_v28 = vpop.f32.mrf.mxu2  ;;  %v886_v31 = vpop.f32.mrf.mxu0 }
  0xb2   : > { %v926_v29 = vpop.f32.mrf.mxu3  ;;  %v900_v32 = vpop.f32.mrf.mxu1  ;;  %v913_v33 = vadd.f32 %v912_v28, %v899_v30  ;;  %v887_v34 = vadd.f32 %v1659_v25, %v886_v31  ;;  %v1717_v25 = vmov 0   ;;  %v1065_v31 = vlaneseq }
  0xb3   : > { %1657 = vset.pattern.permute.xlu2 %v1717_v25  ;;  %1658 = vset.pattern.permute.xlu0 %v1717_v25 }
  0xb4   : > { %v927_v37 = vadd.f32 %v926_v29, %v913_v33  ;;  %v901_v38 = vadd.f32 %v900_v32, %v887_v34  ;;  %1068 = vperm.xlu2 %1657, %v1064_v24   ;;  %v1066_v32 = vand.u32 127, %v1065_v31  ;;  %v1718_v34 = vmov 0.0  }
  0xb9   : > { %v914_v35 = vpop.f32.mrf.mxu2 }
  0xba   : > { %v928_v36 = vpop.f32.mrf.mxu3  ;;  %v915_v42 = vadd.f32 %v914_v35, %v901_v38 }
  0xbc   : > { %v929_v46 = vadd.f32 %v928_v36, %v915_v42  ;;  %v1100_v36 = vld [vmem:[%s302_s19] sm:$0xff] }
  0xc9   : > { %v940_v39 = vpop.f32.mrf.mxu0 }
  0xca   : > { %v941_v40 = vadd.f32 %v940_v39, %v927_v37  ;;  %v954_v41 = vpop.f32.mrf.mxu1 }
  0xcc   : > { %v955_v43 = vadd.f32 %v954_v41, %v941_v40 }
  0xd1   : > { %v968_v44 = vpop.f32.mrf.mxu2  ;;  %v942_v48 = vpop.f32.mrf.mxu0 }
  0xd2   : > { %v982_v45 = vpop.f32.mrf.mxu3  ;;  %v969_v47 = vadd.f32 %v968_v44, %v955_v43  ;;  %v943_v50 = vadd.f32 %v942_v48, %v929_v46  ;;  %v956_v52 = vpop.f32.mrf.mxu1 }
  0xd4   : > { %v983_v49 = vadd.f32 %v982_v45, %v969_v47  ;;  %v957_v53 = vadd.f32 %v956_v52, %v943_v50 }
  0xd6   : > { %v987_v51 = vmax.f32 %v983_v49, 0.0 }
  0xd8   : > { %v989_v54 = vmul.f32 %v987_v51, %v987_v51 }
  0xd9   : > { %v970_v55 = vpop.f32.mrf.mxu2 }
  0xda   : > { %v971_v56 = vadd.f32 %v970_v55, %v957_v53  ;;  %991 = vadd.xlane.f32.xlu0 %v989_v54  ;;  %v984_v57 = vpop.f32.mrf.mxu3 }
  0xdc   : > { %v985_v58 = vadd.f32 %v984_v57, %v971_v56 }
  0xde   : > { %v988_v59 = vmax.f32 %v985_v58, 0.0 }
  0xe0   : > { %v990_v60 = vmul.f32 %v988_v59, %v988_v59 }
  0xe2   : > { %v994_v61 = vsel %vm993_vm0, %v990_v60, 0.0 }
  0xe3   : > { %995 = vadd.xlane.f32.xlu0 %v994_v61 }
  0xf7   : > { %1114 = vperm.xlu0 %1658, %v1100_v36  }
 0x10e   : > { %v1069_v33 = vpop.permute.xlu2 %1068 }
 0x10f   : > { %vm1070_vm8 = vcmp.eq.s32.totalorder %v1066_v32, %v1069_v33 }
 0x110   : > { %v1553_v35 = vsel %vm1070_vm8, 1.0, %v1718_v34 }
 0x111   : > { %1554 = vmatpush.msk.msra.mxu1 %vm993_vm0, %v1553_v35 }
 0x14d   : > { %v992_v62 = vpop.xlane.xlu0 %991 }
 0x14e   : > { %v997_v63 = vmax.f32 %v992_v62, 1e-16 }
 0x150   : > { %1660 = vrsqrt.f32 %v997_v63  ;;  %vm1005_vm2 = vweird.f32 %v997_v63 }
 0x156   : > { %v1661_v0 = vpop.eup %1660  ;;  %v996_v1 = vpop.xlane.xlu0 %995 }
 0x157   : > { %v1000_v2 = vmul.f32 %v1661_v0, %v997_v63  ;;  %v998_v3 = vmax.f32 %v996_v1, 1e-16  ;;  %vm1006_vm1 = vweird.f32 %v1661_v0 }
 0x158   : > { %vm1007_vm3 = vmor %vm1005_vm2, %vm1006_vm1 }
 0x159   : > { %v1001_v4 = vmul.f32 %v1661_v0, %v1000_v2  ;;  %1662 = vrsqrt.f32 %v998_v3  ;;  %vm1015_vm5 = vweird.f32 %v998_v3 }
 0x15b   : > { %v1002_v5 = vmul.f32 0.5, %v1001_v4 }
 0x15d   : > { %v1003_v6 = vsub.f32 1.5, %v1002_v5 }
 0x15f   : > { %v1663_v7 = vpop.eup %1662  ;;  %v1004_v8 = vmul.f32 %v1661_v0, %v1003_v6 }
 0x160   : > { %v1010_v9 = vmul.f32 %v1663_v7, %v998_v3  ;;  %vm1016_vm4 = vweird.f32 %v1663_v7 }
 0x161   : > { %v1008_v10 = vsel %vm1007_vm3, %v1661_v0, %v1004_v8  ;;  %vm1017_vm6 = vmor %vm1015_vm5, %vm1016_vm4 }
 0x162   : > { %v1019_v11 = vmul.f32 %v1008_v10, %v987_v51  ;;  %v1011_v12 = vmul.f32 %v1663_v7, %v1010_v9 }
 0x164   : > { %v1012_v13 = vmul.f32 0.5, %v1011_v12  ;;  %v1021_v14 = vpack.c.bf16 %v1019_v11, %v1019_v11 }
 0x166   : > { %v1013_v15 = vsub.f32 1.5, %v1012_v13  ;;  %1033 = vmatpush.bf16.xpose.msra.mxu0 %v1021_v14 }
 0x168   : > { %v1014_v16 = vmul.f32 %v1663_v7, %v1013_v15 }
 0x169   : > { %v1115_v54 = vpop.permute.xlu0 %1114 }
 0x16a   : > { %v1018_v17 = vsel %vm1017_vm6, %v1663_v7, %v1014_v16  ;;  %vm1116_vm13 = vcmp.eq.s32.totalorder %v1066_v32, %v1115_v54 }
 0x16b   : > { %v1020_v18 = vmul.f32 %v1018_v17, %v988_v59  ;;  %v1556_v57 = vsel %vm1116_vm13, 1.0, %v1718_v34 }
 0x16d   : > { %v1022_v19 = vpack.c.bf16 %v1020_v18, %v1019_v11 }
 0x16f   : > { %v1024_v20 = vrot.slane %v1022_v19, 2 }
 0x171   : > { %1034 = vmatmul.bf16.vlgmr.msra.gmra.mxu0 %v1024_v20 }
 0x1ee   : > { %v1035_v21 = vpop.f32.mrf.mxu0 }
 0x1ef   : > { %v1040_v22 = vsel %vm1039_vm7, %v1035_v21, -inf }
 0x1f0   : > { %1041 = vmax.xlane.f32.xlu1 %v1040_v22 }
 0x1f6   : > { %v1037_v23 = vpop.f32.mrf.mxu0 }
 0x263   : > { %v1042_v26 = vpop.xlane.xlu1 %1041 }
 0x264   : > { %v1043_v27 = vsub.f32 %v1035_v21, %v1042_v26 }
 0x266   : > { %v1044_v28 = vmul.f32 1.442695, %v1043_v27 }
 0x268   : > { %1664 = vpow2.f32 %v1044_v28 }
 0x26e   : > { %v1665_v29 = vpop.eup %1664 }
 0x26f   : > { %v1046_v30 = vsel %vm1039_vm7, %v1665_v29, 0.0 }
 0x270   : > { %1047 = vadd.xlane.f32.xlu1 %v1046_v30 }
 0x2e3   : > { %v1048_v37 = vpop.xlane.xlu1 %1047 }
 0x2e4   : > { %1666 = vrcp.f32 %v1048_v37  ;;  %v1060_v41 = vand.u32 2147483648, %v1048_v37  ;;  %v1058_v43 = vand.u32 2147483647, %v1048_v37  ;;  %vm1054_vm10 = vweird.f32 %v1048_v37 }
 0x2e6   : > { %v1061_v45 = vor.u32 1.1754944e-38, %v1060_v41  ;;  %vm1059_vm12 = vcmp.eq.f32.partialorder %v1058_v43, 8.507059e+37 }
 0x2ea   : > { %v1667_v38 = vpop.eup %1666 }
 0x2eb   : > { %v1050_v39 = vmul.f32 %v1667_v38, %v1048_v37  ;;  %vm1055_vm9 = vweird.f32 %v1667_v38 }
 0x2ec   : > { %vm1056_vm11 = vmor %vm1054_vm10, %vm1055_vm9 }
 0x2ed   : > { %v1051_v40 = vsub.f32 1.0, %v1050_v39 }
 0x2ef   : > { %v1052_v42 = vmul.f32 %v1667_v38, %v1051_v40 }
 0x2f1   : > { %v1053_v44 = vadd.f32 %v1667_v38, %v1052_v42 }
 0x2f3   : > { %v1057_v46 = vsel %vm1056_vm11, %v1667_v38, %v1053_v44 }
 0x2f4   : > { %v1062_v47 = vsel %vm1059_vm12, %v1061_v45, %v1057_v46 }
 0x2f5   : > { %v1063_v48 = vmul.f32 %v1665_v29, %v1062_v47 }
 0x2f7   : > { %1555 = vmatmul.msk.f32.vlgmr.msra.gmra.mxu1 %vm1039_vm7, %v1063_v48 }
 0x374   : > { %v1096_v49 = vpop.f32.mrf.mxu1 }
 0x375   : > { %1099 = vst.msk [vmem:[%s309_s23] sm:$0xff] %vm1039_vm7, %v1096_v49  ;;  %v1101_v50 = vsel %vm1039_vm7, %v1096_v49, -inf  ;;  %v1119_v58 = vmul.f32 %v1556_v57, %v1096_v49 }
 0x376   : > { %1102 = vmax.xlane.f32.xlu2 %v1101_v50 }
 0x377   : > { %v1120_v59 = vsel %vm1039_vm7, %v1119_v58, 0.0 }
 0x3e9   : > { %v1103_v51 = vpop.xlane.xlu2 %1102 }
 0x3ea   : > { %v1104_v52 = vsub.f32 %v1096_v49, %v1103_v51 }
 0x3ec   : > { %v1105_v53 = vmul.f32 1.442695, %v1104_v52 }
 0x3ee   : > { %1668 = vpow2.f32 %v1105_v53 }
 0x3f4   : > { %v1669_v55 = vpop.eup %1668 }
 0x3f5   : > { %v1107_v56 = vsel %vm1039_vm7, %v1669_v55, 0.0 }
 0x3f6   : > { %1108 = vadd.xlane.f32.xlu1 %v1107_v56 }
 0x3fe   : > { %1121 = vadd.xlane.f32.xlu1 %v1120_v59 }
 0x469   : > { %v1109_v60 = vpop.xlane.xlu1 %1108 }
 0x46a   : > { %1670 = vlog2.f32 %v1109_v60 }
 0x470   : > { %v1671_v61 = vpop.eup %1670 }
 0x471   : > { %v1111_v62 = vmul.f32 0.6931472, %v1671_v61  ;;  %v1122_v0 = vpop.xlane.xlu1 %1121 }
 0x473   : > { %v1112_v63 = vadd.f32 %v1111_v62, %v1103_v51 }
 0x475   : > { %v1123_v1 = vsub.f32 %v1112_v63, %v1122_v0 }
 0x477   : > { %v1125_v2 = vsel %vm1124_vm14, %v1123_v1, 0.0 }
 0x478   : > { %1126 = vadd.xlane.f32.xlu1 %v1125_v2 }
 0x4eb   : > { %v1127_v3 = vpop.xlane.xlu1 %1126 }
 0x4ec   : > { %v1128_v4 = vrot.slane %v1127_v3, 4 }
 0x4ee   : > { %v1129_v5 = vadd.f32 %v1128_v4, %v1127_v3 }
 0x4f0   : > { %v1130_v6 = vrot.slane %v1129_v5, 2 }
 0x4f2   : > { %v1131_v7 = vadd.f32 %v1130_v6, %v1129_v5 }
 0x4f4   : > { %v1132_v8 = vrot.slane %v1131_v7, 1 }
 0x4f6   : > { %v1133_v9 = vadd.f32 %v1132_v8, %v1131_v7 }
 0x4f8   : > { %1632 = vpush %v1133_v9 }
 0x529   : > { %s1633_s24 = spop %1632 }
 0x52a   : > { %s1135_s29 = smul.f32 0.125, %s1633_s24 }
 0x52c   : > { %v1136_v10 = vstv %s1135_s29 }
 0x52d   : > { %1138 = vst.msk [vmem:[%s305_s28] sm:$0x1] %vm1137_vm15, %v1136_v10 }
 0x52e PF: > { %s18_s21 = sadd.s32 1, %s1712_s21  }
 0x52f   : > { %p15_p7 = scmp.ge.s32.totalorder %s18_s21, 4  }
 0x531   :  { %17 = sbr.rel (!%p15_p7) target bundleno = 1 (0x1), region = 93 }
 0x536   :  { %1170 = vsyncpa [#allocation3], 1 }
 0x537   :  { %1172 = vsyncpa [#allocation3 + $0x1], 1 }

</bundles_post_ra>
